<compile_context>
chip_gen: v7x
topology: tpu7x:2x2x1
jax: 0.10.0
libtpu: 0.0.40
codegen_flags: <defaults>
</compile_context>

<pallas_src>
import jax
import jax.numpy as jnp
from jax.experimental import pallas as pl
from jax.experimental.pallas import tpu as pltpu


def mlp_kernel(x_ref, w1_ref, b1_ref, w2_ref, b2_ref, w3_ref, b3_ref, o_ref):
    """One batch tile, batch on lanes everywhere.

    x_ref : (4,  TILE_B)   w1_ref: (L2, 4)   b1_ref: (L2, 1)
    w2_ref: (L3, L2)       b2_ref: (L3, 1)
    w3_ref: (L3, 1)        b3_ref: (1,)  [SMEM scalar]
    o_ref : (1,  TILE_B)
    """
    def sigmoid(z):
        # One EUP push (tanh) vs two (exp + reciprocal) for jax.nn.sigmoid.
        return 0.5 * jnp.tanh(0.5 * z) + 0.5

    xt = x_ref[...]                                                   # (4, TILE_B)

    h1 = sigmoid(jnp.dot(w1_ref[...], xt,
                         preferred_element_type=jnp.float32) + b1_ref[...])   # (L2, TILE_B)
    h2 = sigmoid(jnp.dot(w2_ref[...], h1,
                         preferred_element_type=jnp.float32) + b2_ref[...])   # (L3, TILE_B)

    # Final layer as a VPU weighted sum over the L3 sublanes (no M=1 MXU pass):
    # out[0, :] = sum_k w3[k] * h2[k, :] + b3
    h3 = jnp.sum(w3_ref[...] * h2, axis=0, keepdims=True) + b3_ref[0]         # (1, TILE_B)
    o_ref[...] = sigmoid(h3).astype(o_ref.dtype)


def net_forward(x, params, *, tile_b: int = 16384):
    """Forward pass of `Net`:  sigmoid(fc3(sigmoid(fc2(sigmoid(fc1(x)))))).

    x: (B, 4) float32
    params (torch nn.Linear layout, see init_params):
        w1 (L2, 4), b1 (L2, 1), w2 (L3, L2), b2 (L3, 1), w3 (L3, 1), b3 (1,)
    returns: (B, 1) float32
    """
    B = x.shape[0]
    L2 = params["w1"].shape[0]
    L3 = params["w2"].shape[0]

    # Lane-multiple tile (legal (1, tile_b) output block, lane-dense stores).
    tile_b = max(128, ((int(tile_b) + 127) // 128) * 128)
    # Cap so medium/large B gets >= 2 grid tiles (v7x megacore sharding).
    two_tc_tile = max(128, pl.cdiv(pl.cdiv(B, 2), 128) * 128)
    tile_b = min(tile_b, two_tc_tile)

    n_tiles = pl.cdiv(B, tile_b)
    b_pad = n_tiles * tile_b

    # Transpose + pad in the wrapper: batch lands on the lane axis.
    xt = jnp.pad(x.T, ((0, 0), (0, b_pad - B)))                       # (4, b_pad)

    out = pl.pallas_call(
        mlp_kernel,
        out_shape=jax.ShapeDtypeStruct((1, b_pad), jnp.float32),
        grid=(n_tiles,),
        in_specs=[
            pl.BlockSpec((4, tile_b), lambda i: (0, i)),              # x: batch-tiled, lane-dense
            pl.BlockSpec((L2, 4),  lambda i: (0, 0)),                 # weights/biases: VMEM-resident
            pl.BlockSpec((L2, 1),  lambda i: (0, 0)),
            pl.BlockSpec((L3, L2), lambda i: (0, 0)),
            pl.BlockSpec((L3, 1),  lambda i: (0, 0)),
            pl.BlockSpec((L3, 1),  lambda i: (0, 0)),                 # w3 column (sublane-aligned)
            pl.BlockSpec(memory_space=pltpu.MemorySpace.SMEM),        # b3 scalar in SMEM
        ],
        out_specs=pl.BlockSpec((1, tile_b), lambda i: (0, i)),        # lane-dense output slab
        compiler_params=pltpu.CompilerParams(
            dimension_semantics=("parallel",)),                       # shard batch tiles across TCs
    )(xt, params["w1"], params["b1"], params["w2"], params["b2"],
      params["w3"], params["b3"])

    return out[0, :B].reshape(B, 1)


def init_params(key, L2, L3):
    """Deterministic init mimicking nn.Linear's uniform(-1/sqrt(fan_in), +)."""
    ks = jax.random.split(key, 6)

    def lin(kw, kb, fan_in, fan_out):
        bound = 1.0 / jnp.sqrt(jnp.float32(fan_in))
        w = jax.random.uniform(kw, (fan_out, fan_in), jnp.float32, -bound, bound)
        b = jax.random.uniform(kb, (fan_out,), jnp.float32, -bound, bound)
        return w, b

    w1, b1 = lin(ks[0], ks[1], 4, L2)      # fc1.weight (L2, 4), fc1.bias (L2,)
    w2, b2 = lin(ks[2], ks[3], L2, L3)     # fc2.weight (L3, L2)
    w3, b3 = lin(ks[4], ks[5], L3, 1)      # fc3.weight (1, L3)
    return {
        "w1": w1, "b1": b1.reshape(L2, 1),
        "w2": w2, "b2": b2.reshape(L3, 1),
        "w3": w3.reshape(L3, 1),           # fc3.weight.T: sublane-aligned for VPU sum
        "b3": b3,                          # (1,) scalar -> SMEM
    }


def _reference(x, params):
    h = jax.nn.sigmoid(x @ params["w1"].T + params["b1"].T)
    h = jax.nn.sigmoid(h @ params["w2"].T + params["b2"].T)
    return jax.nn.sigmoid(h @ params["w3"] + params["b3"])


if __name__ == "__main__":
    key = jax.random.PRNGKey(0)
    k_x, k_p = jax.random.split(key)

    B, L2, L3 = 8, 32, 16                  # iris-like: 4 input features, prob output
    x = jax.random.uniform(k_x, (B, 4), jnp.float32, 0.0, 8.0)
    params = init_params(k_p, L2, L3)

    out = jax.block_until_ready(net_forward(x, params))
    assert out.shape == (B, 1)
    assert jnp.allclose(out, _reference(x, params), atol=1e-5), "mismatch vs reference"

    # Second check: multi-tile grid + tail padding (B not a multiple of tile_b).
    B2 = 300
    x2 = jax.random.uniform(jax.random.PRNGKey(1), (B2, 4), jnp.float32, 0.0, 8.0)
    out2 = jax.block_until_ready(net_forward(x2, params, tile_b=128))
    assert out2.shape == (B2, 1)
    assert jnp.allclose(out2, _reference(x2, params), atol=1e-5), "mismatch vs reference (tiled)"

    print("KERNEL_OK")
</pallas_src>

<mosaic_0001>
module attributes {stable_mosaic.version = 11 : i64} {
  func.func @mlp_kernel(%arg0: i32, %arg1: memref<4x128xf32, #tpu.memory_space<vmem>>, %arg2: memref<32x4xf32, #tpu.memory_space<vmem>>, %arg3: memref<32x1xf32, #tpu.memory_space<vmem>>, %arg4: memref<16x32xf32, #tpu.memory_space<vmem>>, %arg5: memref<16x1xf32, #tpu.memory_space<vmem>>, %arg6: memref<16x1xf32, #tpu.memory_space<vmem>>, %arg7: memref<1xf32, #tpu.memory_space<smem>>, %arg8: memref<1x128xf32, #tpu.memory_space<vmem>>) attributes {dimension_semantics = [#tpu.dimension_semantics<parallel>], iteration_bounds = array<i64: 1>, scalar_prefetch = 0 : i64, scratch_operands = 0 : i64, tpu.core_type = #tpu.core_type<tc>, window_params = [{transform_indices = @transform_0, window_bounds = array<i64: 4, 128>}, {pipeline_mode = #tpu.pipeline_mode<synchronous>, transform_indices = @transform_1, window_bounds = array<i64: 32, 4>}, {pipeline_mode = #tpu.pipeline_mode<synchronous>, transform_indices = @transform_2, window_bounds = array<i64: 32, 1>}, {pipeline_mode = #tpu.pipeline_mode<synchronous>, transform_indices = @transform_3, window_bounds = array<i64: 16, 32>}, {pipeline_mode = #tpu.pipeline_mode<synchronous>, transform_indices = @transform_4, window_bounds = array<i64: 16, 1>}, {pipeline_mode = #tpu.pipeline_mode<synchronous>, transform_indices = @transform_5, window_bounds = array<i64: 16, 1>}, {transform_indices = @transform_6, window_bounds = array<i64: 1>}, {transform_indices = @transform_7, window_bounds = array<i64: 1, 128>}]} {
    %c0 = arith.constant 0 : index
    %c0_0 = arith.constant 0 : index
    %0 = vector.load %arg1[%c0, %c0_0] : memref<4x128xf32, #tpu.memory_space<vmem>>, vector<4x128xf32>
    %c0_1 = arith.constant 0 : index
    %c0_2 = arith.constant 0 : index
    %1 = vector.load %arg2[%c0_1, %c0_2] : memref<32x4xf32, #tpu.memory_space<vmem>>, vector<32x4xf32>
    %cst = arith.constant dense<0.000000e+00> : vector<32x128xf32>
    %2 = tpu.matmul %1, %0, %cst {dimension_numbers = #tpu.dot_dimension_numbers<[1], [0], [0], [1], [0, 0, 1, 1], [], []>} : vector<32x4xf32>, vector<4x128xf32>, vector<32x128xf32> -> vector<32x128xf32>
    %c0_3 = arith.constant 0 : index
    %c0_4 = arith.constant 0 : index
    %3 = vector.load %arg3[%c0_3, %c0_4] : memref<32x1xf32, #tpu.memory_space<vmem>>, vector<32x1xf32>
    %4 = vector.broadcast %3 : vector<32x1xf32> to vector<32x128xf32>
    %5 = arith.addf %2, %4 : vector<32x128xf32>
    %cst_5 = arith.constant 5.000000e-01 : f32
    %6 = vector.broadcast %cst_5 : f32 to vector<32x128xf32>
    %7 = arith.mulf %6, %5 : vector<32x128xf32>
    %8 = math.tanh %7 : vector<32x128xf32>
    %cst_6 = arith.constant 5.000000e-01 : f32
    %9 = vector.broadcast %cst_6 : f32 to vector<32x128xf32>
    %10 = arith.mulf %9, %8 : vector<32x128xf32>
    %cst_7 = arith.constant 5.000000e-01 : f32
    %11 = vector.broadcast %cst_7 : f32 to vector<32x128xf32>
    %12 = arith.addf %10, %11 : vector<32x128xf32>
    %c0_8 = arith.constant 0 : index
    %c0_9 = arith.constant 0 : index
    %13 = vector.load %arg4[%c0_8, %c0_9] : memref<16x32xf32, #tpu.memory_space<vmem>>, vector<16x32xf32>
    %cst_10 = arith.constant dense<0.000000e+00> : vector<16x128xf32>
    %14 = tpu.matmul %13, %12, %cst_10 {dimension_numbers = #tpu.dot_dimension_numbers<[1], [0], [0], [1], [0, 0, 1, 1], [], []>} : vector<16x32xf32>, vector<32x128xf32>, vector<16x128xf32> -> vector<16x128xf32>
    %c0_11 = arith.constant 0 : index
    %c0_12 = arith.constant 0 : index
    %15 = vector.load %arg5[%c0_11, %c0_12] : memref<16x1xf32, #tpu.memory_space<vmem>>, vector<16x1xf32>
    %16 = vector.broadcast %15 : vector<16x1xf32> to vector<16x128xf32>
    %17 = arith.addf %14, %16 : vector<16x128xf32>
    %cst_13 = arith.constant 5.000000e-01 : f32
    %18 = vector.broadcast %cst_13 : f32 to vector<16x128xf32>
    %19 = arith.mulf %18, %17 : vector<16x128xf32>
    %20 = math.tanh %19 : vector<16x128xf32>
    %cst_14 = arith.constant 5.000000e-01 : f32
    %21 = vector.broadcast %cst_14 : f32 to vector<16x128xf32>
    %22 = arith.mulf %21, %20 : vector<16x128xf32>
    %cst_15 = arith.constant 5.000000e-01 : f32
    %23 = vector.broadcast %cst_15 : f32 to vector<16x128xf32>
    %24 = arith.addf %22, %23 : vector<16x128xf32>
    %c0_16 = arith.constant 0 : index
    %c0_17 = arith.constant 0 : index
    %25 = vector.load %arg6[%c0_16, %c0_17] : memref<16x1xf32, #tpu.memory_space<vmem>>, vector<16x1xf32>
    %26 = vector.broadcast %25 : vector<16x1xf32> to vector<16x128xf32>
    %27 = arith.mulf %26, %24 : vector<16x128xf32>
    %cst_18 = arith.constant dense<0.000000e+00> : vector<128xf32>
    %28 = vector.multi_reduction <add>, %27, %cst_18 [0] : vector<16x128xf32> to vector<128xf32>
    %29 = vector.shape_cast %28 : vector<128xf32> to vector<1x128xf32>
    %c0_19 = arith.constant 0 : index
    %30 = memref.load %arg7[%c0_19] : memref<1xf32, #tpu.memory_space<smem>>
    %31 = vector.broadcast %30 : f32 to vector<1x128xf32>
    %32 = arith.addf %29, %31 : vector<1x128xf32>
    %cst_20 = arith.constant 5.000000e-01 : f32
    %33 = vector.broadcast %cst_20 : f32 to vector<1x128xf32>
    %34 = arith.mulf %33, %32 : vector<1x128xf32>
    %35 = math.tanh %34 : vector<1x128xf32>
    %cst_21 = arith.constant 5.000000e-01 : f32
    %36 = vector.broadcast %cst_21 : f32 to vector<1x128xf32>
    %37 = arith.mulf %36, %35 : vector<1x128xf32>
    %cst_22 = arith.constant 5.000000e-01 : f32
    %38 = vector.broadcast %cst_22 : f32 to vector<1x128xf32>
    %39 = arith.addf %37, %38 : vector<1x128xf32>
    %c0_23 = arith.constant 0 : index
    %c0_24 = arith.constant 0 : index
    %40 = vector.load %arg8[%c0_23, %c0_24] : memref<1x128xf32, #tpu.memory_space<vmem>>, vector<1x128xf32>
    tpu.vector_store %arg8[%c0_23, %c0_24], %39 {strides = array<i32>} : memref<1x128xf32, #tpu.memory_space<vmem>>, vector<1x128xf32>,
    return
  }
  func.func @transform_0(%arg0: i32) -> (i32, i32) {
    %c0_i32 = arith.constant 0 : i32
    %c0_i32_0 = arith.constant 0 : i32
    return %c0_i32, %arg0 : i32, i32
  }
  func.func @transform_1(%arg0: i32) -> (i32, i32) {
    %c0_i32 = arith.constant 0 : i32
    %c0_i32_0 = arith.constant 0 : i32
    %c0_i32_1 = arith.constant 0 : i32
    return %c0_i32, %c0_i32_0 : i32, i32
  }
  func.func @transform_2(%arg0: i32) -> (i32, i32) {
    %c0_i32 = arith.constant 0 : i32
    %c0_i32_0 = arith.constant 0 : i32
    %c0_i32_1 = arith.constant 0 : i32
    return %c0_i32, %c0_i32_0 : i32, i32
  }
  func.func @transform_3(%arg0: i32) -> (i32, i32) {
    %c0_i32 = arith.constant 0 : i32
    %c0_i32_0 = arith.constant 0 : i32
    %c0_i32_1 = arith.constant 0 : i32
    return %c0_i32, %c0_i32_0 : i32, i32
  }
  func.func @transform_4(%arg0: i32) -> (i32, i32) {
    %c0_i32 = arith.constant 0 : i32
    %c0_i32_0 = arith.constant 0 : i32
    %c0_i32_1 = arith.constant 0 : i32
    return %c0_i32, %c0_i32_0 : i32, i32
  }
  func.func @transform_5(%arg0: i32) -> (i32, i32) {
    %c0_i32 = arith.constant 0 : i32
    %c0_i32_0 = arith.constant 0 : i32
    %c0_i32_1 = arith.constant 0 : i32
    return %c0_i32, %c0_i32_0 : i32, i32
  }
  func.func @transform_6(%arg0: i32) -> i32 {
    %c0_i32 = arith.constant 0 : i32
    %c0_i32_0 = arith.constant 0 : i32
    return %c0_i32 : i32
  }
  func.func @transform_7(%arg0: i32) -> (i32, i32) {
    %c0_i32 = arith.constant 0 : i32
    %c0_i32_0 = arith.constant 0 : i32
    return %c0_i32, %arg0 : i32, i32
  }
}

</mosaic_0001>

<bundles_post_ra>
// kernel: tpu_custom_call.1
= control target key start
LH: loop header
LB: loop body
LE: loop exit
PB: predicated region body
PF: predicated region fallthrough
CT: control target
= control target key end

     0   :  { %vm70_vm0 = vcmask 1043456   ;;  %vm57_vm1 = vcmask 31744   ;;  %v409_v5 = vmov 0   ;;  %s517_s0 = inlined_call_operand.vmem [shape: f32[4,128], index: 0, kind: input, shape index: {}]   ;;  %s518_s1 = inlined_call_operand.vmem [shape: f32[32,4], index: 1, kind: input, shape index: {}]   ;;  %s519_s2 = inlined_call_operand.vmem [shape: f32[32,1], index: 2, kind: input, shape index: {}]   ;;  %s520_s3 = inlined_call_operand.vmem [shape: f32[16,32], index: 3, kind: input, shape index: {}]   ;;  %s521_s4 = inlined_call_operand.vmem [shape: f32[16,1], index: 4, kind: input, shape index: {}]   ;;  %s522_s5 = inlined_call_operand.vmem [shape: f32[16,1], index: 5, kind: input, shape index: {}]   ;;  %s523_s6 = inlined_call_operand.<no memory space> [shape: f32[1], index: 6, kind: input, shape index: {}]   ;;  %s524_s7 = inlined_call_operand.hbm [shape: f32[1,128], index: 7, kind: output, shape index: {}]  }
   0x1   :  { %v28_v0 = vld [vmem:[%s517_s0] sm:$0xf]  ;;  %v30_v2 = vld [vmem:[%s518_s1 + $0x8] sm:$0xff]  ;;  %v31_v3 = vld [vmem:[%s518_s1 + $0x10] sm:$0xff]  ;;  %369 = vset.pattern.permute.xlu0 %v409_v5  ;;  %370 = vset.pattern.permute.xlu1 %v409_v5 }
   0x2   :  { %v29_v1 = vld [vmem:[%s518_s1] sm:$0xff]  ;;  %340 = vmatprep.subr.msk.mxu0 %vm70_vm0, %v28_v0  ;;  %v35_v6 = vld [vmem:[%s519_s2 + $0x10] sm:$0xff]  ;;  %v32_v7 = vld [vmem:[%s518_s1 + $0x18] sm:$0xff] }
   0x3   :  { %342 = vmatprep.mubr.msk.f32.mxu0 %vm57_vm1, %v29_v1  ;;  %v33_v4 = vld [vmem:[%s519_s2] sm:$0xff]  ;;  %341 = vmatpush3.msk.msra.mxu0 %vm70_vm0, %v28_v0  ;;  %v34_v8 = vld [vmem:[%s519_s2 + $0x8] sm:$0xff] }
   0x4   :  { %343 = vmatmul.mubr.msk.f32.vlgmr.msra.gmra.mrb[0].mxu0 %vm57_vm1, %v30_v2  ;;  %39 = vperm.xlu0 %369, %v33_v4  }
   0x5   :  { %345 = vmatprep.mubr.msk.f32.mxu0 %vm57_vm1, %v31_v3 }
   0x6   :  { %13 = vsyncpa [#allocation4], 0  ;;  %49 = vperm.xlu1 %370, %v35_v6   ;;  %v36_v9 = vld [vmem:[%s519_s2 + $0x18] sm:$0xff]  ;;  %v177_v10 = vld [vmem:[%s521_s4] sm:$0xff]  ;;  %vm189_vm2 = vcmask 261120   ;;  %v301_v6 = vstv %s523_s6  ;;  %s410_s27 = smov [#allocation3]  }
   0x7   :  { %v178_v11 = vld [vmem:[%s521_s4 + $0x8] sm:$0xff]  ;;  %v279_v12 = vld [vmem:[%s522_s5] sm:$0xff]  ;;  %s314_s28 = sshll.u32 %s410_s27, 4  ;;  %s315_s28 = int_to_ptr.vmem [resolvable:$true] %s314_s28 }
   0x8   :  { %346 = vmatmul.mubr.msk.f32.gmra.mrb[2].mxu0 %vm57_vm1, %v32_v7  ;;  %44 = vperm.xlu0 %369, %v34_v8   ;;  %v280_v13 = vld [vmem:[%s522_s5 + $0x8] sm:$0xff]  ;;  %v175_v14 = vld [vmem:[%s520_s3] sm:$0xff]  ;;  %s385_s29 = scalar_lea.vmem %s315_s28, 16  ;;  %s389_s30 = scalar_lea.vmem %s315_s28, 32 }
   0x9   :  { %356 = vmatprep.mubr.msk.f32.mxu1 %vm189_vm2, %v175_v14  ;;  %v176_v45 = vld [vmem:[%s520_s3 + $0x8] sm:$0xff]  ;;  %p386_p0 = scmp.ne.s32.totalorder %s315_s28, %s385_s29  ;;  %p390_p1 = scmp.lt.s32.totalorder %s315_s28, %s315_s28 }
   0xa   :  { %54 = vperm.xlu1 %370, %v36_v9   ;;  %p391_p2 = scmp.lt.s32.totalorder %s389_s30, %s385_s29 }
   0xc   :  { %181 = vperm.xlu0 %369, %v177_v10   ;;  %p392_p3 = por %p391_p2, %p390_p1 }
   0xe   :  { %186 = vperm.xlu1 %370, %v178_v11   ;;  %p393_p4 = pnand %p392_p3, %p386_p0 }
  0x10   :  { %283 = vperm.xlu0 %369, %v279_v12  }
  0x12   :  { %288 = vperm.xlu1 %370, %v280_v13  }
  0x83   :  { %v40_v15 = vpop.permute.xlu0 %39 }
  0x85   :  { %v50_v16 = vpop.permute.xlu1 %49 }
  0x87   :  { %v45_v17 = vpop.permute.xlu0 %44 }
  0x89   :  { %v55_v23 = vpop.permute.xlu1 %54 }
  0x8b   :  { %v182_v48 = vpop.permute.xlu0 %181 }
  0x8d   :  { %v187_v46 = vpop.permute.xlu1 %186 }
  0x8f   :  { %v284_v61 = vpop.permute.xlu0 %283 }
  0x91   :  { %v289_v59 = vpop.permute.xlu1 %288 }
  0xd7   :  { %v344_v18 = vpop.f32.mrb[0].mxu0 }
  0xd8   :  { %v146_v19 = vadd.f32 %v344_v18, %v45_v17  ;;  %v140_v20 = vpop.f32.mrb[1].mxu0 }
  0xd9   :  { %v141_v21 = vadd.f32 %v140_v20, %v40_v15 }
  0xda   :  { %v160_v22 = vmul.f32 0.5, %v146_v19 }
  0xdb   :  { %v159_v24 = vmul.f32 0.5, %v141_v21  ;;  %v347_v25 = vpop.f32.mrb[2].mxu0 }
  0xdc   :  { %371 = vtanh.f32 %v160_v22  ;;  %v156_v26 = vadd.f32 %v347_v25, %v55_v23  ;;  %v150_v27 = vpop.f32.mrb[3].mxu0 }
  0xdd   :  { %373 = vtanh.f32 %v159_v24  ;;  %v151_v28 = vadd.f32 %v150_v27, %v50_v16 }
  0xde   :  { %v162_v29 = vmul.f32 0.5, %v156_v26 }
  0xdf   :  { %v161_v30 = vmul.f32 0.5, %v151_v28 }
  0xe0   :  { %375 = vtanh.f32 %v162_v29 }
  0xe1   :  { %377 = vtanh.f32 %v161_v30 }
  0xe6   :  { %v372_v31 = vpop.eup %371 }
  0xe7   :  { %v374_v32 = vpop.eup %373  ;;  %v168_v33 = vmul.f32 0.5, %v372_v31 }
  0xe8   :  { %v167_v34 = vmul.f32 0.5, %v374_v32 }
  0xe9   :  { %v172_v35 = vadd.f32 0.5, %v168_v33 }
  0xea   :  { %v376_v36 = vpop.eup %375  ;;  %v171_v37 = vadd.f32 0.5, %v167_v34 }
  0xeb   :  { %v378_v38 = vpop.eup %377  ;;  %v170_v39 = vmul.f32 0.5, %v376_v36 }
  0xec   :  { %v169_v40 = vmul.f32 0.5, %v378_v38  ;;  %v359_v41 = vpack.c.bf16 %v172_v35, %v171_v37 }
  0xed   :  { %v174_v42 = vadd.f32 0.5, %v170_v39 }
  0xee   :  { %v173_v43 = vadd.f32 0.5, %v169_v40  ;;  %360 = vmatprep.subr.bf16.mxu1 %v359_v41 }
  0xef   :  { %362 = vmatpush3.bf16.msra.mxu1 %v359_v41 }
  0xf0   :  { %v363_v44 = vpack.c.bf16 %v174_v42, %v173_v43 }
  0xf2   :  { %364 = vmatprep.subr.bf16.mxu1 %v363_v44 }
  0xf3   :  { %366 = vmatpush3.bf16.msra.mxu1 %v363_v44 }
  0xf6   :  { %357 = vmatmul.mubr.msk.f32.vlgmr.msra.gmra.mrb[0].mxu1 %vm189_vm2, %v176_v45 }
 0x1c9   :  { %v358_v47 = vpop.f32.mrb[0].mxu1 }
 0x1ca   :  { %v268_v49 = vadd.f32 %v358_v47, %v187_v46  ;;  %v262_v50 = vpop.f32.mrb[1].mxu1 }
 0x1cb   :  { %v263_v51 = vadd.f32 %v262_v50, %v182_v48 }
 0x1cc   :  { %v272_v52 = vmul.f32 0.5, %v268_v49 }
 0x1cd   :  { %v271_v53 = vmul.f32 0.5, %v263_v51 }
 0x1ce   :  { %379 = vtanh.f32 %v272_v52 }
 0x1cf   :  { %381 = vtanh.f32 %v271_v53 }
 0x1d8   :  { %v380_v54 = vpop.eup %379 }
 0x1d9   :  { %v382_v55 = vpop.eup %381  ;;  %v276_v56 = vmul.f32 0.5, %v380_v54 }
 0x1da   :  { %v275_v57 = vmul.f32 0.5, %v382_v55 }
 0x1db   :  { %v278_v58 = vadd.f32 0.5, %v276_v56 }
 0x1dc   :  { %v277_v60 = vadd.f32 0.5, %v275_v57 }
 0x1dd   :  { %v292_v62 = vmul.f32 %v289_v59, %v278_v58 }
 0x1de   :  { %v291_v63 = vmul.f32 %v284_v61, %v277_v60 }
 0x1e0   :  { %v293_v0 = vadd.f32 %v292_v62, %v291_v63 }
 0x1e2   :  { %v294_v1 = vrot.slane %v293_v0, 4 }
 0x1e4   :  { %v295_v2 = vadd.f32 %v294_v1, %v293_v0 }
 0x1e6   :  { %v296_v3 = vrot.slane %v295_v2, 2 }
 0x1e8   :  { %v297_v4 = vadd.f32 %v296_v3, %v295_v2 }
 0x1ea   :  { %v298_v5 = vrot.slane %v297_v4, 1 }
 0x1ec   :  { %v299_v7 = vadd.f32 %v298_v5, %v297_v4 }
 0x1ee   :  { %v302_v8 = vadd.f32 %v301_v6, %v299_v7 }
 0x1f0   :  { %v303_v9 = vmul.f32 0.5, %v302_v8 }
 0x1f2   :  { %383 = vtanh.f32 %v303_v9 }
 0x1fc   :  { %v384_v10 = vpop.eup %383 }
 0x1fd   :  { %v305_v11 = vmul.f32 0.5, %v384_v10 }
 0x1ff   :  { %v306_v12 = vadd.f32 0.5, %v305_v11 }
 0x201   :  { %307 = vst [vmem:[#allocation3] sm:$0x1] %v306_v12 }
 0x202   :  { %396 = shalt.err (!%p393_p4)
}
 0x203   :  { %s397_s9 = scalar_lea.hbm %s524_s7, 16 }
 0x204   :  { %p398_p5 = scmp.ne.s32.totalorder %s524_s7, %s397_s9  ;;  %p401_p6 = scmp.lt.u32.totalorder %s397_s9, %s524_s7 }
 0x206   :  { %p403_p7 = pnand %p401_p6, %p398_p5 }
 0x208   :  { %406 = shalt.err (!%p403_p7)
}
 0x209   :  { %317 = dma.vmem_to_hbm [thread:$0]  %s315_s28, 16, %s524_s7, [#allocation4]  }
 0x20a   :  { %407 = dma.done.wait [#allocation4], 16  }
 0x20b   :  { %408 = vsyncadd [#allocation4], 4294967280 }
 0x20c   :  { %321 = vsyncpa [#allocation4], 1 }

</bundles_post_ra>
